<compile_context>
chip_gen: v6e
topology: v6e:2x2x1
jax: 0.10.0
libtpu: 0.0.40
codegen_flags: <defaults>
</compile_context>

<pallas_src>
import functools

import jax
import jax.numpy as jnp
from jax.experimental import pallas as pl
from jax.experimental.pallas import tpu as pltpu


_LANE = 128
_SUBLANE_BF16 = 16          # bf16 packs 16 rows per sublane vreg
_TM_MAX = 512
_TN_MAX = 512
_TK_MAX = 2048              # bf16 K-slab that comfortably fits VMEM budget
_VMEM_LIMIT = 48 * 1024 * 1024   # safe on v5e/v6e (128 MiB) and v7x (64 MiB)
_TINY_WORK = 1 << 21        # below M*N*K of ~2M, plain XLA dot is faster


def _round_up(a, b):
    return ((a + b - 1) // b) * b


# ----------------------------------------------------------------------------
# Kernels
# ----------------------------------------------------------------------------
def _linear_kernel_fused_k(x_ref, w_ref, b_ref, o_ref):
    # x_ref: (tm, Kp) bf16; w_ref: (Kp, tn) bf16; b_ref: (1, tn) f32.
    acc = jnp.dot(x_ref[...], w_ref[...], preferred_element_type=jnp.float32)
    o_ref[...] = (acc + b_ref[...]).astype(o_ref.dtype)


def _linear_kernel_split_k(x_ref, w_ref, b_ref, o_ref, acc_ref):
    # Same as above but accumulating over the K grid axis in f32 VMEM scratch.
    k = pl.program_id(2)

    @pl.when(k == 0)
    def _():
        acc_ref[...] = jnp.zeros_like(acc_ref)

    acc_ref[...] += jnp.dot(x_ref[...], w_ref[...],
                            preferred_element_type=jnp.float32)

    @pl.when(k == pl.num_programs(2) - 1)
    def _():
        o_ref[...] = (acc_ref[...] + b_ref[...]).astype(o_ref.dtype)


# ----------------------------------------------------------------------------
# Tile selection (pad-aware, bf16-aware, v7x dual-TC aware)
# ----------------------------------------------------------------------------
def _pick_tile(dim, candidates):
    best, best_pad = candidates[0], _round_up(dim, candidates[0]) - dim
    for c in candidates[1:]:
        pad = _round_up(dim, c) - dim
        if pad < best_pad:
            best, best_pad = c, pad
    return best


def _choose_tiles(M, Np, Kp):
    # tm: multiple of 16 (bf16 packing). Small M -> single M block so the
    # weight streams from HBM exactly once.
    if _round_up(M, _SUBLANE_BF16) <= _TM_MAX:
        tm = _round_up(M, _SUBLANE_BF16)
    else:
        tm = _pick_tile(M, (512, 256, 128))
    Mp = _round_up(M, tm)

    # tn: largest multiple of 128 (<= 512) dividing Np (Np is a 128-multiple).
    tn = _TN_MAX
    while tn > _LANE and Np % tn != 0:
        tn //= 2

    # tk: collapse the K axis if it fits, else largest divisor of Kp.
    if Kp <= _TK_MAX:
        tk = Kp
    else:
        tk = _TK_MAX
        while Kp % tk != 0:
            tk //= 2

    # v7x has two TensorCores sharded over "parallel" axes: make sure the
    # parallel grid has >= 2 steps when we can split N without masking.
    while (Mp // tm) * (Np // tn) < 2 and tn > _LANE:
        tn //= 2

    return tm, Mp, tn, tk


# ----------------------------------------------------------------------------
# Per-forward Pallas dispatch
# ----------------------------------------------------------------------------
@functools.partial(jax.jit, static_argnames=("n", "tm", "tn", "tk"))
def _pallas_linear(x2, w_t, b_p, *, n, tm, tn, tk):
    # x2: (M, K) activations; w_t: (Kp, Np) bf16 pre-transposed/padded weight;
    # b_p: (1, Np) f32 padded bias.
    M, K = x2.shape
    Kp, Np = w_t.shape
    Mp = _round_up(M, tm)

    xp = x2.astype(jnp.bfloat16)
    if Mp != M or Kp != K:
        xp = jnp.pad(xp, ((0, Mp - M), (0, Kp - K)))

    grid_m, grid_n, grid_k = Mp // tm, Np // tn, Kp // tk
    out_dtype = x2.dtype

    if grid_k == 1:
        out = pl.pallas_call(
            _linear_kernel_fused_k,
            out_shape=jax.ShapeDtypeStruct((Mp, Np), out_dtype),
            grid=(grid_m, grid_n),
            in_specs=[
                pl.BlockSpec((tm, tk), lambda i, j: (i, 0)),   # x
                pl.BlockSpec((tk, tn), lambda i, j: (0, j)),   # W_eff^T
                pl.BlockSpec((1, tn), lambda i, j: (0, j)),    # bias
            ],
            out_specs=pl.BlockSpec((tm, tn), lambda i, j: (i, j)),
            compiler_params=pltpu.CompilerParams(
                dimension_semantics=("parallel", "parallel"),
                vmem_limit_bytes=_VMEM_LIMIT,
            ),
        )(xp, w_t, b_p)
    else:
        out = pl.pallas_call(
            _linear_kernel_split_k,
            out_shape=jax.ShapeDtypeStruct((Mp, Np), out_dtype),
            grid=(grid_m, grid_n, grid_k),
            in_specs=[
                pl.BlockSpec((tm, tk), lambda i, j, k: (i, k)),   # x
                pl.BlockSpec((tk, tn), lambda i, j, k: (k, j)),   # W_eff^T
                pl.BlockSpec((1, tn), lambda i, j, k: (0, j)),    # bias
            ],
            out_specs=pl.BlockSpec((tm, tn), lambda i, j, k: (i, j)),
            scratch_shapes=[pltpu.VMEM((tm, tn), jnp.float32)],
            compiler_params=pltpu.CompilerParams(
                dimension_semantics=("parallel", "parallel", "arbitrary"),
                vmem_limit_bytes=_VMEM_LIMIT,
            ),
        )(xp, w_t, b_p)

    return out[:M, :n]


# ----------------------------------------------------------------------------
# JAX mirror of Linear_ParameterInjector
# ----------------------------------------------------------------------------
class LinearParameterInjectorJAX:
    """JAX mirror of Linear_ParameterInjector wrapping a Linear layer.

    The effective weight (W or W + W_inject) is rebuilt, transposed to (K, N),
    cast to bf16 and padded only when the injection state changes
    (sample / enable / disable), so each forward streams one ready-made
    weight slab through the Pallas matmul kernel.
    """

    def __init__(self, weight, bias, noise_norm=0.1, noise_pattern="prop",
                 noise_norm_ex=1.0, weight_init=None):
        self.weight_original = jnp.asarray(weight)          # (N, K)
        self.bias = jnp.asarray(bias)                        # (N,)
        self.weight_init = None if weight_init is None else jnp.asarray(weight_init)
        self.noise_norm = noise_norm
        self.noise_pattern = noise_pattern
        self.noise_norm_ex = noise_norm_ex
        self.weight_inject = jnp.zeros_like(self.weight_original)
        self.enabled = False
        self._refresh_effective()

    # -- state -----------------------------------------------------------
    def get_state(self):
        return {"noise_norm": self.noise_norm,
                "noise_pattern": self.noise_pattern,
                "noise_norm_ex": self.noise_norm_ex}

    def set_norm(self, noise_norm, noise_pattern=None, noise_norm_ex=None):
        if noise_norm is not None:
            self.noise_norm = noise_norm
        if noise_pattern is not None:
            self.noise_pattern = noise_pattern
        if noise_norm_ex is not None:
            self.noise_norm_ex = noise_norm_ex

    def _refresh_effective(self):
        if self.enabled:
            w_eff = self.weight_original + self.weight_inject
        else:
            w_eff = self.weight_original
        self._w_eff = w_eff                                   # (N, K) f32
        N, K = w_eff.shape
        Kp, Np = _round_up(K, _LANE), _round_up(N, _LANE)
        # One-time transpose + pad + bf16 cast (runs at refresh, not per forward).
        self._w_t_padded = jnp.pad(
            w_eff.T, ((0, Kp - K), (0, Np - N))).astype(jnp.bfloat16)
        self._bias_padded = jnp.pad(
            self.bias.astype(jnp.float32).reshape(1, N), ((0, 0), (0, Np - N)))

    def enable(self):
        self.enabled = True
        self._refresh_effective()

    def disable(self):
        self.enabled = False
        self._refresh_effective()

    def sample(self, key):
        w = self.weight_original
        noise = jax.random.normal(key, w.shape, dtype=w.dtype)
        if self.noise_pattern == "prop":
            self.weight_inject = self.noise_norm * noise * jnp.abs(w)
        elif self.noise_pattern == "indep":
            self.weight_inject = self.noise_norm * noise
        elif self.noise_pattern == "inv":
            self.weight_inject = self.noise_norm * noise * w
        elif self.noise_pattern == "subtract":
            self.weight_inject = (
                self.noise_norm
                - self.noise_norm * self.noise_norm_ex * jnp.abs(w)) * noise
        elif self.noise_pattern == "prop-deterministic":
            base = w if self.weight_init is None else (w - self.weight_init)
            self.weight_inject = self.noise_norm * self.noise_norm_ex * base
        self._refresh_effective()

    def get_param_norm(self):
        if self.weight_init is not None:
            return jnp.abs(self.weight_original - self.weight_init).mean()
        return self.weight_original.size

    # -- forward ----------------------------------------------------------
    def forward(self, x):
        *lead, K = x.shape
        N = self._w_eff.shape[0]
        M = 1
        for d in lead:
            M *= d
        x2 = x.reshape(M, K)

        if M * N * K < _TINY_WORK:
            # Sub-tile problem: pad->pallas->slice would dominate; use XLA dot.
            out2 = (jnp.dot(x2, self._w_eff.T,
                            preferred_element_type=jnp.float32)
                    + self.bias).astype(x.dtype)
            return out2.reshape(*lead, N)

        Kp, Np = self._w_t_padded.shape
        tm, _, tn, tk = _choose_tiles(M, Np, Kp)
        out2 = _pallas_linear(x2, self._w_t_padded, self._bias_padded,
                              n=N, tm=tm, tn=tn, tk=tk)
        return out2.reshape(*lead, N)


if __name__ == "__main__":
    key = jax.random.PRNGKey(0)
    k_w, k_b, k_x, k_xs, k_noise = jax.random.split(key, 5)

    # --- shapes that exercise the Pallas kernel -------------------------
    batch, seq, in_features, out_features = 2, 128, 256, 256
    bound = 1.0 / jnp.sqrt(in_features)
    weight = jax.random.uniform(k_w, (out_features, in_features),
                                jnp.float32, -bound, bound)
    bias = jax.random.uniform(k_b, (out_features,), jnp.float32, -bound, bound)
    x = jax.random.normal(k_x, (batch, seq, in_features), jnp.float32)

    inj = LinearParameterInjectorJAX(weight, bias,
                                     noise_norm=0.1, noise_pattern="prop")

    # Disabled path (plain linear).
    y_disabled = inj.forward(x)
    jax.block_until_ready(y_disabled)

    # Enabled path with sampled proportional noise injection.
    inj.sample(k_noise)
    inj.enable()
    y_enabled = inj.forward(x)
    jax.block_until_ready(y_enabled)

    # References following the same bf16-inputs / f32-accumulate path.
    x2 = x.reshape(-1, in_features).astype(jnp.bfloat16)
    w_eff = weight + inj.weight_inject
    ref_dis = (jnp.dot(x2, weight.T.astype(jnp.bfloat16),
                       preferred_element_type=jnp.float32) + bias)
    ref_en = (jnp.dot(x2, w_eff.T.astype(jnp.bfloat16),
                      preferred_element_type=jnp.float32) + bias)
    assert y_disabled.shape == (batch, seq, out_features)
    assert jnp.allclose(y_disabled.reshape(-1, out_features), ref_dis,
                        atol=1e-2, rtol=1e-2)
    assert jnp.allclose(y_enabled.reshape(-1, out_features), ref_en,
                        atol=1e-2, rtol=1e-2)

    # --- tiny-shape fallback path (plain XLA dot, f32) -------------------
    x_small = jax.random.normal(k_xs, (2, 8, in_features), jnp.float32)
    y_small = inj.forward(x_small)
    jax.block_until_ready(y_small)
    ref_small = jnp.einsum("bsk,nk->bsn", x_small, w_eff) + bias
    assert jnp.allclose(y_small, ref_small, atol=1e-5, rtol=1e-5)

    print("KERNEL_OK")
</pallas_src>

<mosaic_0001>
module attributes {stable_mosaic.version = 11 : i64} {
  func.func @_linear_kernel_fused_k(%arg0: i32, %arg1: i32, %arg2: memref<256x256xbf16, #tpu.memory_space<vmem>>, %arg3: memref<256x128xbf16, #tpu.memory_space<vmem>>, %arg4: memref<1x128xf32, #tpu.memory_space<vmem>>, %arg5: memref<256x128xf32, #tpu.memory_space<vmem>>) attributes {dimension_semantics = [#tpu.dimension_semantics<parallel>, #tpu.dimension_semantics<parallel>], iteration_bounds = array<i64: 1, 2>, scalar_prefetch = 0 : i64, scratch_operands = 0 : i64, tpu.core_type = #tpu.core_type<tc>, window_params = [{transform_indices = @transform_0, window_bounds = array<i64: 256, 256>}, {transform_indices = @transform_1, window_bounds = array<i64: 256, 128>}, {transform_indices = @transform_2, window_bounds = array<i64: 1, 128>}, {transform_indices = @transform_3, window_bounds = array<i64: 256, 128>}]} {
    %c0 = arith.constant 0 : index
    %c0_0 = arith.constant 0 : index
    %0 = vector.load %arg2[%c0, %c0_0] : memref<256x256xbf16, #tpu.memory_space<vmem>>, vector<256x256xbf16>
    %c0_1 = arith.constant 0 : index
    %c0_2 = arith.constant 0 : index
    %1 = vector.load %arg3[%c0_1, %c0_2] : memref<256x128xbf16, #tpu.memory_space<vmem>>, vector<256x128xbf16>
    %cst = arith.constant dense<0.000000e+00> : vector<256x128xf32>
    %2 = tpu.matmul %0, %1, %cst {dimension_numbers = #tpu.dot_dimension_numbers<[1], [0], [0], [1], [0, 0, 1, 1], [], []>} : vector<256x256xbf16>, vector<256x128xbf16>, vector<256x128xf32> -> vector<256x128xf32>
    %c0_3 = arith.constant 0 : index
    %c0_4 = arith.constant 0 : index
    %3 = vector.load %arg4[%c0_3, %c0_4] : memref<1x128xf32, #tpu.memory_space<vmem>>, vector<1x128xf32>
    %4 = vector.broadcast %3 : vector<1x128xf32> to vector<256x128xf32>
    %5 = arith.addf %2, %4 : vector<256x128xf32>
    %c0_5 = arith.constant 0 : index
    %c0_6 = arith.constant 0 : index
    %6 = vector.load %arg5[%c0_5, %c0_6] : memref<256x128xf32, #tpu.memory_space<vmem>>, vector<256x128xf32>
    tpu.vector_store %arg5[%c0_5, %c0_6], %5 {strides = array<i32>} : memref<256x128xf32, #tpu.memory_space<vmem>>, vector<256x128xf32>,
    return
  }
  func.func @transform_0(%arg0: i32, %arg1: i32) -> (i32, i32) {
    %c0_i32 = arith.constant 0 : i32
    %c0_i32_0 = arith.constant 0 : i32
    return %arg0, %c0_i32 : i32, i32
  }
  func.func @transform_1(%arg0: i32, %arg1: i32) -> (i32, i32) {
    %c0_i32 = arith.constant 0 : i32
    %c0_i32_0 = arith.constant 0 : i32
    return %c0_i32, %arg1 : i32, i32
  }
  func.func @transform_2(%arg0: i32, %arg1: i32) -> (i32, i32) {
    %c0_i32 = arith.constant 0 : i32
    %c0_i32_0 = arith.constant 0 : i32
    return %c0_i32, %arg1 : i32, i32
  }
  func.func @transform_3(%arg0: i32, %arg1: i32) -> (i32, i32) {
    %c0_i32 = arith.constant 0 : i32
    return %arg0, %arg1 : i32, i32
  }
}

</mosaic_0001>

<bundles_post_ra>
// kernel: _pallas_linear.1
= control target key start
LH: loop header
LB: loop body
LE: loop exit
PB: predicated region body
PF: predicated region fallthrough
CT: control target
= control target key end

     0   :  { %8 = vsyncpa [#allocation4], 0  ;;  %s1823_s0 = inlined_call_operand.vmem [shape: bf16[256,256], index: 0, kind: input, shape index: {}]   ;;  %s1824_s1 = inlined_call_operand.vmem [shape: bf16[256,256], index: 1, kind: input, shape index: {}]   ;;  %s1825_s2 = inlined_call_operand.vmem [shape: f32[1,256], index: 2, kind: input, shape index: {}]   ;;  %s1826_s3 = inlined_call_operand.hbm [shape: f32[256,256], index: 3, kind: output, shape index: {}]  }
   0x1   :  { %10 = vsyncpa [#allocation4 + $0x1], 0  ;;  %s1444_s12 = smov 0   ;;  %s1446_s13 = smov 0  }
   0x2   :  { %s1448_s14 = smov 0   ;;  %s1450_s15 = smov 0  }
   0x3   :  { %s1452_s16 = smov 0   ;;  %s1454_s17 = smov 0  }
   0x4 LB: > { %s1029_s18 = sadd.s32 4294967295, %s1418_s17   ;;  %s1030_s19 = sadd.s32 4294967294, %s1418_s17   ;;  %s1418_s17 = sphi %s1454_s17, %s16_s17   ;;  %s1414_s16 = sphi %s1452_s16, %s1833_s16   ;;  %s1410_s15 = sphi %s1450_s15, %s1832_s15   ;;  %s1406_s14 = sphi %s1448_s14, %s1831_s14   ;;  %s1402_s13 = sphi %s1446_s13, %s1830_s13   ;;  %s1398_s12 = sphi %s1444_s12, %s1829_s12  }
   0x5   : > { %s25_s20 = sadd.s32 1, %s1414_s16  ;;  %s61_s21 = sadd.s32 1, %s1406_s14 }
   0x6   : > { %p26_p0 = scmp.ge.s32.totalorder %s25_s20, 2  ;;  %p68_p1 = scmp.ne.s32.totalorder %s1406_s14, %s1402_s13 }
   0x7   : > { %p69_p2 = scmp.eq.s32.totalorder %s1418_s17, 0  ;;  %p126_p3 = scmp.eq.s32.totalorder %s1029_s18, 1 }
   0x8   : > { %s1835_s20 = smov (%p26_p0, %s25_s20), 0  ;;  %p131_p6 = scmp.ne.s32.totalorder %s1402_s13, %s1398_s12 }
   0x9   : > { %p70_p4 = por %p69_p2, %p68_p1  ;;  %p1483_p5 = por %p126_p3, %p68_p1 }
   0xa   : > { %s58_s23 = ssub.s32 %s1414_s16, %s1835_s20  ;;  %p132_p8 = scmp.eq.s32.totalorder %s1030_s19, 1 }
   0xb   : > { %p59_p7 = scmp.eq.s32.totalorder %s58_s23, 0  ;;  %p1033_p10 = scmp.ge.s32.totalorder %s1418_s17, 2 }
   0xc   : > { %p1494_p9 = por %p132_p8, %p131_p6 }
   0xd   : > { %s1492_s24 = scalar_select %p59_p7, %s1406_s14, %s61_s21  }
   0xe   : > { %158 = sbr.rel (%p1033_p10) target bundleno = 44 (0x2c), region = 20 }
  0x13   : > { %161 = sbr.rel (!%p70_p4) target bundleno = 44 (0x2c), region = 24  ;;  %s163_s26 = sand.u32 (%p70_p4), 1, %s1406_s14  }
  0x14   : > { %s1035_s27 = sshll.u32 (%p70_p4), %s1414_s16, 2  ;;  %s1034_s28 = sshll.u32 (%p70_p4), %s163_s26, 7 }
  0x15   : > { %s1506_s4 = scalar_lea.vmem (%p70_p4), %s1824_s1, %s1035_s27  ;;  %s1510_s5 = scalar_lea.vmem (%p70_p4), [#allocation2], %s1034_s28 }
  0x16   : > { %v184_v0 = vld [vmem:[%s1506_s4] sm:$0xf] (%p70_p4)  ;;  %v186_v1 = vld [vmem:[%s1506_s4 + $0x8] sm:$0xf] (%p70_p4)  ;;  %v188_v2 = vld [vmem:[%s1506_s4 + $0x10] sm:$0xf] (%p70_p4) }
  0x17   : > { %185 = vst [vmem:[%s1510_s5] sm:$0xf] (%p70_p4), %v184_v0  ;;  %187 = vst [vmem:[%s1510_s5 + $0x4] sm:$0xf] (%p70_p4), %v186_v1  ;;  %v190_v3 = vld [vmem:[%s1506_s4 + $0x18] sm:$0xf] (%p70_p4) }
  0x18   : > { %v192_v4 = vld [vmem:[%s1506_s4 + $0x20] sm:$0xf]  ;;  %189 = vst [vmem:[%s1510_s5 + $0x8] sm:$0xf] %v188_v2  ;;  %191 = vst [vmem:[%s1510_s5 + $0xc] sm:$0xf] %v190_v3 }
  0x19   : > { %193 = vst [vmem:[%s1510_s5 + $0x10] sm:$0xf] %v192_v4  ;;  %v194_v5 = vld [vmem:[%s1506_s4 + $0x28] sm:$0xf]  ;;  %v196_v6 = vld [vmem:[%s1506_s4 + $0x30] sm:$0xf] }
  0x1a   : > { %v198_v7 = vld [vmem:[%s1506_s4 + $0x38] sm:$0xf]  ;;  %195 = vst [vmem:[%s1510_s5 + $0x14] sm:$0xf] %v194_v5  ;;  %197 = vst [vmem:[%s1510_s5 + $0x18] sm:$0xf] %v196_v6 }
  0x1b   : > { %199 = vst [vmem:[%s1510_s5 + $0x1c] sm:$0xf] %v198_v7  ;;  %v200_v8 = vld [vmem:[%s1506_s4 + $0x40] sm:$0xf]  ;;  %v202_v9 = vld [vmem:[%s1506_s4 + $0x48] sm:$0xf] }
  0x1c   : > { %v204_v10 = vld [vmem:[%s1506_s4 + $0x50] sm:$0xf]  ;;  %201 = vst [vmem:[%s1510_s5 + $0x20] sm:$0xf] %v200_v8  ;;  %203 = vst [vmem:[%s1510_s5 + $0x24] sm:$0xf] %v202_v9 }
  0x1d   : > { %205 = vst [vmem:[%s1510_s5 + $0x28] sm:$0xf] %v204_v10  ;;  %v206_v11 = vld [vmem:[%s1506_s4 + $0x58] sm:$0xf]  ;;  %v208_v12 = vld [vmem:[%s1506_s4 + $0x60] sm:$0xf] }
  0x1e   : > { %v210_v13 = vld [vmem:[%s1506_s4 + $0x68] sm:$0xf]  ;;  %207 = vst [vmem:[%s1510_s5 + $0x2c] sm:$0xf] %v206_v11  ;;  %209 = vst [vmem:[%s1510_s5 + $0x30] sm:$0xf] %v208_v12 }
  0x1f   : > { %211 = vst [vmem:[%s1510_s5 + $0x34] sm:$0xf] %v210_v13  ;;  %v212_v14 = vld [vmem:[%s1506_s4 + $0x70] sm:$0xf]  ;;  %v214_v15 = vld [vmem:[%s1506_s4 + $0x78] sm:$0xf] }
  0x20   : > { %v216_v16 = vld [vmem:[%s1506_s4 + $0x80] sm:$0xf]  ;;  %213 = vst [vmem:[%s1510_s5 + $0x38] sm:$0xf] %v212_v14  ;;  %215 = vst [vmem:[%s1510_s5 + $0x3c] sm:$0xf] %v214_v15 }
  0x21   : > { %217 = vst [vmem:[%s1510_s5 + $0x40] sm:$0xf] %v216_v16  ;;  %v218_v17 = vld [vmem:[%s1506_s4 + $0x88] sm:$0xf]  ;;  %v220_v18 = vld [vmem:[%s1506_s4 + $0x90] sm:$0xf] }
  0x22   : > { %v222_v19 = vld [vmem:[%s1506_s4 + $0x98] sm:$0xf]  ;;  %219 = vst [vmem:[%s1510_s5 + $0x44] sm:$0xf] %v218_v17  ;;  %221 = vst [vmem:[%s1510_s5 + $0x48] sm:$0xf] %v220_v18 }
  0x23   : > { %223 = vst [vmem:[%s1510_s5 + $0x4c] sm:$0xf] %v222_v19  ;;  %v224_v20 = vld [vmem:[%s1506_s4 + $0xa0] sm:$0xf]  ;;  %v226_v21 = vld [vmem:[%s1506_s4 + $0xa8] sm:$0xf] }
  0x24   : > { %v228_v22 = vld [vmem:[%s1506_s4 + $0xb0] sm:$0xf]  ;;  %225 = vst [vmem:[%s1510_s5 + $0x50] sm:$0xf] %v224_v20  ;;  %227 = vst [vmem:[%s1510_s5 + $0x54] sm:$0xf] %v226_v21 }
  0x25   : > { %229 = vst [vmem:[%s1510_s5 + $0x58] sm:$0xf] %v228_v22  ;;  %v230_v23 = vld [vmem:[%s1506_s4 + $0xb8] sm:$0xf]  ;;  %v232_v24 = vld [vmem:[%s1506_s4 + $0xc0] sm:$0xf] }
  0x26   : > { %v234_v25 = vld [vmem:[%s1506_s4 + $0xc8] sm:$0xf]  ;;  %231 = vst [vmem:[%s1510_s5 + $0x5c] sm:$0xf] %v230_v23  ;;  %233 = vst [vmem:[%s1510_s5 + $0x60] sm:$0xf] %v232_v24 }
  0x27   : > { %235 = vst [vmem:[%s1510_s5 + $0x64] sm:$0xf] %v234_v25  ;;  %v236_v26 = vld [vmem:[%s1506_s4 + $0xd0] sm:$0xf]  ;;  %v238_v27 = vld [vmem:[%s1506_s4 + $0xd8] sm:$0xf] }
  0x28   : > { %v240_v28 = vld [vmem:[%s1506_s4 + $0xe0] sm:$0xf]  ;;  %237 = vst [vmem:[%s1510_s5 + $0x68] sm:$0xf] %v236_v26  ;;  %239 = vst [vmem:[%s1510_s5 + $0x6c] sm:$0xf] %v238_v27 }
  0x29   : > { %241 = vst [vmem:[%s1510_s5 + $0x70] sm:$0xf] %v240_v28  ;;  %v242_v29 = vld [vmem:[%s1506_s4 + $0xe8] sm:$0xf]  ;;  %v244_v30 = vld [vmem:[%s1506_s4 + $0xf0] sm:$0xf] }
  0x2a   : > { %v246_v31 = vld [vmem:[%s1506_s4 + $0xf8] sm:$0xf]  ;;  %243 = vst [vmem:[%s1510_s5 + $0x74] sm:$0xf] %v242_v29  ;;  %245 = vst [vmem:[%s1510_s5 + $0x78] sm:$0xf] %v244_v30 }
  0x2b   : > { %247 = vst [vmem:[%s1510_s5 + $0x7c] sm:$0xf] %v246_v31 }
  0x2c PF: > { %p1036_p11 = scmp.ge.s32.totalorder %s1418_s17, 1  ;;  %p340_p12 = scmp.lt.s32.totalorder %s1418_s17, 3 }
  0x2e   : > { %p341_p13 = pnand %p1036_p11, %p340_p12 }
  0x2f   : > { %s1577_s6 = sand.u32 (!%p341_p13), 1, %s1402_s13   ;;  %p386_p0 = scmp.lt.s32.totalorder (!%p341_p13), %s1410_s15, 1 }
  0x30   : > { %344 = sbr.rel (%p341_p13) target bundleno = 361 (0x169), region = 69  ;;  %s1037_s7 = sshll.u32 (!%p341_p13), %s1577_s6, 7 }
  0x31   : > { %s1586_s18 = scalar_lea.vmem (!%p341_p13), [#allocation2], %s1037_s7  ;;  %s1038_s19 = sshll.u32 (!%p341_p13), %s1577_s6, 8 }
  0x32   : > { %s1704_s21 = scalar_lea.vmem (!%p341_p13), [#allocation3], %s1038_s19  ;;  %s1089_s23 = sshll.u32 (!%p341_p13), %s1410_s15, 7 }
  0x33   : > { %s927_s26 = sshll.u32 (!%p341_p13), %s1704_s21, 4  ;;  %s1769_s29 = scalar_lea.hbm (!%p341_p13), %s1826_s3, %s1089_s23  ;;  %s1771_s26 = int_to_ptr.vmem [resolvable:$true] %s927_s26 }
  0x34   : > { %s1342_s30 = scalar_lea.vmem (!%p341_p13), %s1771_s26, 4096  ;;  %s1420_s4 = smov (!%p341_p13), [#allocation3]  }
  0x35   : > { %v1296_v32 = vld [vmem:[%s1823_s0 + $0x4] ss:$8 sps:$4 sm:$0xff]   ;;  %v1278_v34 = vld [vmem:[%s1586_s18 + $0x78] sm:$0xff]   ;;  %v1280_v36 = vld [vmem:[%s1586_s18 + $0x70] sm:$0xff]   ;;  %s387_s9 = scalar_select %p386_p0, %s1410_s15, 1 }
  0x36   : > { %v1299_v33 = vld [vmem:[%s1823_s0 + $0x84] ss:$8 sps:$4 sm:$0xff]   ;;  %750 = vmatprep.mubr.bf16.mxu0 %v1296_v32  ;;  %v1279_v35 = vld [vmem:[%s1586_s18 + $0x38] sm:$0xff]   ;;  %1092 = vmatprep.subr.bf16.mxu0 %v1278_v34  ;;  %v1281_v37 = vld [vmem:[%s1586_s18 + $0x30] sm:$0xff]   ;;  %s912_s15 = scalar_lea.sflag [#allocation4], %s1577_s6  ;;  %p1343_p1 = scmp.ne.s32.totalorder %s1771_s26, %s1342_s30 }
  0x37   : > { %814 = vmatprep.mubr.bf16.mxu1 %v1299_v33  ;;  %1204 = vmatprep.subr.bf16.mxu1 %v1278_v34  ;;  %v1282_v38 = vld [vmem:[%s1586_s18 + $0x68] sm:$0xff]   ;;  %v1284_v40 = vld [vmem:[%s1586_s18 + $0x60] sm:$0xff]   ;;  %v1286_v42 = vld [vmem:[%s1586_s18 + $0x58] sm:$0xff]   ;;  %s1346_s5 = sshll.u32 %s1420_s4, 4  ;;  %s1347_s5 = int_to_ptr.vmem [resolvable:$false] %s1346_s5 }
  0x38   : > { %1093 = vmatpush3.bf16.msra.mxu0 %v1279_v35  ;;  %1212 = vmatpush3.bf16.msra.mxu1 %v1279_v35  ;;  %v1283_v39 = vld [vmem:[%s1586_s18 + $0x28] sm:$0xff]   ;;  %v1285_v41 = vld [vmem:[%s1586_s18 + $0x20] sm:$0xff]   ;;  %v1287_v43 = vld [vmem:[%s1586_s18 + $0x18] sm:$0xff]   ;;  %p1344_p2 = pnand %p1343_p1, %p1483_p5  ;;  %s1348_s7 = scalar_lea.vmem %s1347_s5, 8192 }
  0x39   : > { %1094 = vmatprep.subr.bf16.mxu0 %v1280_v36  ;;  %1205 = vmatprep.subr.bf16.mxu1 %v1280_v36  ;;  %v1288_v44 = vld [vmem:[%s1586_s18 + $0x50] sm:$0xff]   ;;  %v1290_v46 = vld [vmem:[%s1586_s18 + $0x48] sm:$0xff]   ;;  %v1292_v48 = vld [vmem:[%s1586_s18 + $0x40] sm:$0xff]   ;;  %p1349_p4 = scmp.lt.s32.totalorder %s1771_s26, %s1347_s5  ;;  %p1350_p6 = scmp.lt.s32.totalorder %s1348_s7, %s1342_s30 }
  0x3a   : > { %v1289_v45 = vld [vmem:[%s1586_s18 + $0x10] sm:$0xff]   ;;  %v1291_v47 = vld [vmem:[%s1586_s18 + $0x8] sm:$0xff]   ;;  %v1293_v49 = vld [vmem:[%s1586_s18] sm:$0xff]   ;;  %s388_s18 = scalar_lea.vmem %s1825_s2, %s387_s9  ;;  %p1345_p3 = pneg %p1344_p2 }
  0x3b   : > { %v1294_v50 = vld [vmem:[%s1823_s0] ss:$8 sps:$4 sm:$0xff]   ;;  %v1300_v52 = vld [vmem:[%s1823_s0 + $0x14] ss:$8 sps:$4 sm:$0xff]   ;;  %v1304_v54 = vld [vmem:[%s1823_s0 + $0x10] ss:$8 sps:$4 sm:$0xff]   ;;  %p1351_p7 = por %p1350_p6, %p1349_p4 }
  0x3c   : > { %1095 = vmatpush3.bf16.msra.mxu0 %v1281_v37  ;;  %1213 = vmatpush3.bf16.msra.mxu1 %v1281_v37  ;;  %v1297_v51 = vld [vmem:[%s1823_s0 + $0x80] ss:$8 sps:$4 sm:$0xff]   ;;  %v1302_v53 = vld [vmem:[%s1823_s0 + $0x94] ss:$8 sps:$4 sm:$0xff]   ;;  %v1305_v55 = vld [vmem:[%s1823_s0 + $0x90] ss:$8 sps:$4 sm:$0xff]  }
  0x3d   : > { %1096 = vmatprep.subr.bf16.mxu0 %v1282_v38  ;;  %1206 = vmatprep.subr.bf16.mxu1 %v1282_v38  ;;  %v1306_v56 = vld [vmem:[%s1823_s0 + $0x24] ss:$8 sps:$4 sm:$0xff]   ;;  %v1310_v58 = vld [vmem:[%s1823_s0 + $0x20] ss:$8 sps:$4 sm:$0xff]   ;;  %v1312_v60 = vld [vmem:[%s1823_s0 + $0x34] ss:$8 sps:$4 sm:$0xff]   ;;  %p1352_p8 = pnand %p1351_p7, %p1345_p3 }
  0x3e   : > { %v1308_v57 = vld [vmem:[%s1823_s0 + $0xa4] ss:$8 sps:$4 sm:$0xff]   ;;  %v1311_v59 = vld [vmem:[%s1823_s0 + $0xa0] ss:$8 sps:$4 sm:$0xff]   ;;  %v1314_v61 = vld [vmem:[%s1823_s0 + $0xb4] ss:$8 sps:$4 sm:$0xff]  }
  0x3f   : > { %v1316_v62 = vld [vmem:[%s1823_s0 + $0x30] ss:$8 sps:$4 sm:$0xff]   ;;  %v1318_v0 = vld [vmem:[%s1823_s0 + $0x44] ss:$8 sps:$4 sm:$0xff]   ;;  %v1322_v2 = vld [vmem:[%s1823_s0 + $0x40] ss:$8 sps:$4 sm:$0xff]  }
  0x40   : > { %1097 = vmatpush3.bf16.msra.mxu0 %v1283_v39  ;;  %1214 = vmatpush3.bf16.msra.mxu1 %v1283_v39  ;;  %v1317_v63 = vld [vmem:[%s1823_s0 + $0xb0] ss:$8 sps:$4 sm:$0xff]   ;;  %v1320_v1 = vld [vmem:[%s1823_s0 + $0xc4] ss:$8 sps:$4 sm:$0xff]   ;;  %v1323_v3 = vld [vmem:[%s1823_s0 + $0xc0] ss:$8 sps:$4 sm:$0xff]  }
  0x41   : > { %1098 = vmatprep.subr.bf16.mxu0 %v1284_v40  ;;  %1207 = vmatprep.subr.bf16.mxu1 %v1284_v40  ;;  %v1324_v4 = vld [vmem:[%s1823_s0 + $0x54] ss:$8 sps:$4 sm:$0xff]   ;;  %v1328_v6 = vld [vmem:[%s1823_s0 + $0x50] ss:$8 sps:$4 sm:$0xff]   ;;  %v1330_v8 = vld [vmem:[%s1823_s0 + $0x64] ss:$8 sps:$4 sm:$0xff]  }
  0x42   : > { %v1326_v5 = vld [vmem:[%s1823_s0 + $0xd4] ss:$8 sps:$4 sm:$0xff]   ;;  %v1329_v7 = vld [vmem:[%s1823_s0 + $0xd0] ss:$8 sps:$4 sm:$0xff]   ;;  %v1332_v9 = vld [vmem:[%s1823_s0 + $0xe4] ss:$8 sps:$4 sm:$0xff]  }
  0x43   : > { %v1334_v10 = vld [vmem:[%s1823_s0 + $0x60] ss:$8 sps:$4 sm:$0xff]   ;;  %v1336_v12 = vld [vmem:[%s1823_s0 + $0x74] ss:$8 sps:$4 sm:$0xff]   ;;  %v1340_v14 = vld [vmem:[%s1823_s0 + $0x70] ss:$8 sps:$4 sm:$0xff]  }
  0x44   : > { %1099 = vmatpush3.bf16.msra.mxu0 %v1285_v41  ;;  %1215 = vmatpush3.bf16.msra.mxu1 %v1285_v41  ;;  %v1335_v11 = vld [vmem:[%s1823_s0 + $0xe0] ss:$8 sps:$4 sm:$0xff]   ;;  %v1338_v13 = vld [vmem:[%s1823_s0 + $0xf4] ss:$8 sps:$4 sm:$0xff]   ;;  %v1341_v15 = vld [vmem:[%s1823_s0 + $0xf0] ss:$8 sps:$4 sm:$0xff]  }
  0x45   : > { %1100 = vmatprep.subr.bf16.mxu0 %v1286_v42  ;;  %1208 = vmatprep.subr.bf16.mxu1 %v1286_v42  ;;  %v1700_v18 = vld [vmem:[%s388_s18] ss:$0 sm:$0xff] }
  0x48   : > { %1101 = vmatpush3.bf16.msra.mxu0 %v1287_v43  ;;  %1216 = vmatpush3.bf16.msra.mxu1 %v1287_v43 }
  0x49   : > { %1102 = vmatprep.subr.bf16.mxu0 %v1288_v44  ;;  %1209 = vmatprep.subr.bf16.mxu1 %v1288_v44 }
  0x4c   : > { %1103 = vmatpush3.bf16.msra.mxu0 %v1289_v45  ;;  %1217 = vmatpush3.bf16.msra.mxu1 %v1289_v45 }
  0x4d   : > { %1104 = vmatprep.subr.bf16.mxu0 %v1290_v46  ;;  %1210 = vmatprep.subr.bf16.mxu1 %v1290_v46 }
  0x50   : > { %1105 = vmatpush3.bf16.msra.mxu0 %v1291_v47  ;;  %1218 = vmatpush3.bf16.msra.mxu1 %v1291_v47 }
  0x51   : > { %1106 = vmatprep.subr.bf16.mxu0 %v1292_v48  ;;  %1211 = vmatprep.subr.bf16.mxu1 %v1292_v48 }
  0x54   : > { %1107 = vmatpush3.bf16.msra.mxu0 %v1293_v49  ;;  %1219 = vmatpush3.bf16.msra.mxu1 %v1293_v49 }
  0x57   : > { %751 = vmatmul.mubr.bf16.vlgmr.msra.gmra.mxu0 %v1294_v50  ;;  %815 = vmatmul.mubr.bf16.vlgmr.msra.gmra.mxu1 %v1297_v51 }
  0x58   : > { %758 = vmatprep.mubr.bf16.mxu0 %v1300_v52  ;;  %822 = vmatprep.mubr.bf16.mxu1 %v1302_v53 }
  0x5f   : > { %759 = vmatmul.mubr.bf16.gmra.mxu0 %v1304_v54  ;;  %823 = vmatmul.mubr.bf16.gmra.mxu1 %v1305_v55 }
  0x60   : > { %766 = vmatprep.mubr.bf16.mxu0 %v1306_v56  ;;  %830 = vmatprep.mubr.bf16.mxu1 %v1308_v57 }
  0x67   : > { %767 = vmatmul.mubr.bf16.gmra.mxu0 %v1310_v58  ;;  %831 = vmatmul.mubr.bf16.gmra.mxu1 %v1311_v59 }
  0x68   : > { %774 = vmatprep.mubr.bf16.mxu0 %v1312_v60  ;;  %838 = vmatprep.mubr.bf16.mxu1 %v1314_v61 }
  0x6f   : > { %775 = vmatmul.mubr.bf16.gmra.mxu0 %v1316_v62  ;;  %839 = vmatmul.mubr.bf16.gmra.mxu1 %v1317_v63 }
  0x70   : > { %782 = vmatprep.mubr.bf16.mxu0 %v1318_v0  ;;  %846 = vmatprep.mubr.bf16.mxu1 %v1320_v1 }
  0x77   : > { %783 = vmatmul.mubr.bf16.gmra.mxu0 %v1322_v2  ;;  %847 = vmatmul.mubr.bf16.gmra.mxu1 %v1323_v3 }
  0x78   : > { %790 = vmatprep.mubr.bf16.mxu0 %v1324_v4  ;;  %854 = vmatprep.mubr.bf16.mxu1 %v1326_v5 }
  0x7f   : > { %791 = vmatmul.mubr.bf16.gmra.mxu0 %v1328_v6  ;;  %855 = vmatmul.mubr.bf16.gmra.mxu1 %v1329_v7 }
  0x80   : > { %798 = vmatprep.mubr.bf16.mxu0 %v1330_v8  ;;  %862 = vmatprep.mubr.bf16.mxu1 %v1332_v9 }
  0x87   : > { %799 = vmatmul.mubr.bf16.gmra.mxu0 %v1334_v10  ;;  %863 = vmatmul.mubr.bf16.gmra.mxu1 %v1335_v11 }
  0x88   : > { %806 = vmatprep.mubr.bf16.mxu0 %v1336_v12  ;;  %870 = vmatprep.mubr.bf16.mxu1 %v1338_v13 }
  0x8f   : > { %807 = vmatmul.mubr.bf16.gmra.mxu0 %v1340_v14  ;;  %871 = vmatmul.mubr.bf16.gmra.mxu1 %v1341_v15 }
 0x117   : > { %v1108_v16 = vpop.f32.mrf.mxu0  ;;  %v1156_v17 = vpop.f32.mrf.mxu1 }
 0x119   : > { %v1109_v19 = vpop.f32.mrf.mxu0  ;;  %v1157_v20 = vpop.f32.mrf.mxu1 }
 0x11a   : > { %v1110_v21 = vadd.f32 %v1109_v19, %v1108_v16  ;;  %v1158_v22 = vadd.f32 %v1157_v20, %v1156_v17 }
 0x11b   : > { %v1111_v23 = vpop.f32.mrf.mxu0  ;;  %v1159_v24 = vpop.f32.mrf.mxu1 }
 0x11c   : > { %v753_v25 = vadd.f32 %v1110_v21, %v1700_v18  ;;  %v817_v26 = vadd.f32 %v1158_v22, %v1700_v18 }
 0x11d   : > { %v1112_v27 = vpop.f32.mrf.mxu0  ;;  %v1160_v28 = vpop.f32.mrf.mxu1 }
 0x11e   : > { %879 = vst [vmem:[%s1704_s21] sm:$0xff] %v753_v25  ;;  %895 = vst [vmem:[%s1704_s21 + $0x80] sm:$0xff] %v817_v26  ;;  %v1113_v29 = vadd.f32 %v1112_v27, %v1111_v23  ;;  %v1161_v30 = vadd.f32 %v1160_v28, %v1159_v24 }
 0x11f   : > { %v1114_v31 = vpop.f32.mrf.mxu0  ;;  %v1162_v32 = vpop.f32.mrf.mxu1 }
 0x120   : > { %v756_v33 = vadd.f32 %v1113_v29, %v1700_v18  ;;  %v820_v34 = vadd.f32 %v1161_v30, %v1700_v18 }
 0x121   : > { %v1115_v35 = vpop.f32.mrf.mxu0  ;;  %v1163_v36 = vpop.f32.mrf.mxu1 }
 0x122   : > { %880 = vst [vmem:[%s1704_s21 + $0x8] sm:$0xff] %v756_v33  ;;  %896 = vst [vmem:[%s1704_s21 + $0x88] sm:$0xff] %v820_v34  ;;  %v1116_v37 = vadd.f32 %v1115_v35, %v1114_v31  ;;  %v1164_v38 = vadd.f32 %v1163_v36, %v1162_v32 }
 0x123   : > { %v1117_v39 = vpop.f32.mrf.mxu0  ;;  %v1165_v40 = vpop.f32.mrf.mxu1 }
 0x124   : > { %v761_v41 = vadd.f32 %v1116_v37, %v1700_v18  ;;  %v825_v42 = vadd.f32 %v1164_v38, %v1700_v18 }
 0x125   : > { %v1118_v43 = vpop.f32.mrf.mxu0  ;;  %v1166_v44 = vpop.f32.mrf.mxu1 }
 0x126   : > { %881 = vst [vmem:[%s1704_s21 + $0x10] sm:$0xff] %v761_v41  ;;  %897 = vst [vmem:[%s1704_s21 + $0x90] sm:$0xff] %v825_v42  ;;  %v1119_v45 = vadd.f32 %v1118_v43, %v1117_v39  ;;  %v1167_v46 = vadd.f32 %v1166_v44, %v1165_v40 }
 0x127   : > { %v1120_v47 = vpop.f32.mrf.mxu0  ;;  %v1168_v48 = vpop.f32.mrf.mxu1 }
 0x128   : > { %v764_v49 = vadd.f32 %v1119_v45, %v1700_v18  ;;  %v828_v50 = vadd.f32 %v1167_v46, %v1700_v18 }
 0x129   : > { %v1121_v51 = vpop.f32.mrf.mxu0  ;;  %v1169_v52 = vpop.f32.mrf.mxu1 }
 0x12a   : > { %882 = vst [vmem:[%s1704_s21 + $0x18] sm:$0xff] %v764_v49  ;;  %898 = vst [vmem:[%s1704_s21 + $0x98] sm:$0xff] %v828_v50  ;;  %v1122_v53 = vadd.f32 %v1121_v51, %v1120_v47  ;;  %v1170_v54 = vadd.f32 %v1169_v52, %v1168_v48 }
 0x12b   : > { %v1123_v55 = vpop.f32.mrf.mxu0  ;;  %v1171_v56 = vpop.f32.mrf.mxu1 }
 0x12c   : > { %v769_v57 = vadd.f32 %v1122_v53, %v1700_v18  ;;  %v833_v58 = vadd.f32 %v1170_v54, %v1700_v18 }
 0x12d   : > { %v1124_v59 = vpop.f32.mrf.mxu0  ;;  %v1172_v60 = vpop.f32.mrf.mxu1 }
 0x12e   : > { %883 = vst [vmem:[%s1704_s21 + $0x20] sm:$0xff] %v769_v57  ;;  %899 = vst [vmem:[%s1704_s21 + $0xa0] sm:$0xff] %v833_v58  ;;  %v1125_v61 = vadd.f32 %v1124_v59, %v1123_v55  ;;  %v1173_v62 = vadd.f32 %v1172_v60, %v1171_v56 }
 0x12f   : > { %v1126_v63 = vpop.f32.mrf.mxu0  ;;  %v1174_v0 = vpop.f32.mrf.mxu1 }
 0x130   : > { %v772_v1 = vadd.f32 %v1125_v61, %v1700_v18  ;;  %v836_v2 = vadd.f32 %v1173_v62, %v1700_v18 }
 0x131   : > { %v1127_v3 = vpop.f32.mrf.mxu0  ;;  %v1175_v4 = vpop.f32.mrf.mxu1 }
 0x132   : > { %884 = vst [vmem:[%s1704_s21 + $0x28] sm:$0xff] %v772_v1  ;;  %900 = vst [vmem:[%s1704_s21 + $0xa8] sm:$0xff] %v836_v2  ;;  %v1128_v5 = vadd.f32 %v1127_v3, %v1126_v63  ;;  %v1176_v6 = vadd.f32 %v1175_v4, %v1174_v0 }
 0x133   : > { %v1129_v7 = vpop.f32.mrf.mxu0  ;;  %v1177_v8 = vpop.f32.mrf.mxu1 }
 0x134   : > { %v777_v9 = vadd.f32 %v1128_v5, %v1700_v18  ;;  %v841_v10 = vadd.f32 %v1176_v6, %v1700_v18 }
 0x135   : > { %v1130_v11 = vpop.f32.mrf.mxu0  ;;  %v1178_v12 = vpop.f32.mrf.mxu1 }
 0x136   : > { %885 = vst [vmem:[%s1704_s21 + $0x30] sm:$0xff] %v777_v9  ;;  %901 = vst [vmem:[%s1704_s21 + $0xb0] sm:$0xff] %v841_v10  ;;  %v1131_v13 = vadd.f32 %v1130_v11, %v1129_v7  ;;  %v1179_v14 = vadd.f32 %v1178_v12, %v1177_v8 }
 0x137   : > { %v1132_v15 = vpop.f32.mrf.mxu0  ;;  %v1180_v16 = vpop.f32.mrf.mxu1 }
 0x138   : > { %v780_v17 = vadd.f32 %v1131_v13, %v1700_v18  ;;  %v844_v19 = vadd.f32 %v1179_v14, %v1700_v18 }
 0x139   : > { %v1133_v20 = vpop.f32.mrf.mxu0  ;;  %v1181_v21 = vpop.f32.mrf.mxu1 }
 0x13a   : > { %886 = vst [vmem:[%s1704_s21 + $0x38] sm:$0xff] %v780_v17  ;;  %902 = vst [vmem:[%s1704_s21 + $0xb8] sm:$0xff] %v844_v19  ;;  %v1134_v22 = vadd.f32 %v1133_v20, %v1132_v15  ;;  %v1182_v23 = vadd.f32 %v1181_v21, %v1180_v16 }
 0x13b   : > { %v1135_v24 = vpop.f32.mrf.mxu0  ;;  %v1183_v25 = vpop.f32.mrf.mxu1 }
 0x13c   : > { %v785_v26 = vadd.f32 %v1134_v22, %v1700_v18  ;;  %v849_v27 = vadd.f32 %v1182_v23, %v1700_v18 }
 0x13d   : > { %v1136_v28 = vpop.f32.mrf.mxu0  ;;  %v1184_v29 = vpop.f32.mrf.mxu1 }
 0x13e   : > { %887 = vst [vmem:[%s1704_s21 + $0x40] sm:$0xff] %v785_v26  ;;  %903 = vst [vmem:[%s1704_s21 + $0xc0] sm:$0xff] %v849_v27  ;;  %v1137_v30 = vadd.f32 %v1136_v28, %v1135_v24  ;;  %v1185_v31 = vadd.f32 %v1184_v29, %v1183_v25 }
 0x13f   : > { %v1138_v32 = vpop.f32.mrf.mxu0  ;;  %v1186_v33 = vpop.f32.mrf.mxu1 }
 0x140   : > { %v788_v34 = vadd.f32 %v1137_v30, %v1700_v18  ;;  %v852_v35 = vadd.f32 %v1185_v31, %v1700_v18 }
 0x141   : > { %v1139_v36 = vpop.f32.mrf.mxu0  ;;  %v1187_v37 = vpop.f32.mrf.mxu1 }
 0x142   : > { %888 = vst [vmem:[%s1704_s21 + $0x48] sm:$0xff] %v788_v34  ;;  %904 = vst [vmem:[%s1704_s21 + $0xc8] sm:$0xff] %v852_v35  ;;  %v1140_v38 = vadd.f32 %v1139_v36, %v1138_v32  ;;  %v1188_v39 = vadd.f32 %v1187_v37, %v1186_v33 }
 0x143   : > { %v1141_v40 = vpop.f32.mrf.mxu0  ;;  %v1189_v41 = vpop.f32.mrf.mxu1 }
 0x144   : > { %v793_v42 = vadd.f32 %v1140_v38, %v1700_v18  ;;  %v857_v43 = vadd.f32 %v1188_v39, %v1700_v18 }
 0x145   : > { %v1142_v44 = vpop.f32.mrf.mxu0  ;;  %v1190_v45 = vpop.f32.mrf.mxu1 }
 0x146   : > { %889 = vst [vmem:[%s1704_s21 + $0x50] sm:$0xff] %v793_v42  ;;  %905 = vst [vmem:[%s1704_s21 + $0xd0] sm:$0xff] %v857_v43  ;;  %v1143_v46 = vadd.f32 %v1142_v44, %v1141_v40  ;;  %v1191_v47 = vadd.f32 %v1190_v45, %v1189_v41 }
 0x147   : > { %v1144_v48 = vpop.f32.mrf.mxu0  ;;  %v1192_v49 = vpop.f32.mrf.mxu1 }
 0x148   : > { %v796_v50 = vadd.f32 %v1143_v46, %v1700_v18  ;;  %v860_v51 = vadd.f32 %v1191_v47, %v1700_v18 }
 0x149   : > { %v1145_v52 = vpop.f32.mrf.mxu0  ;;  %v1193_v53 = vpop.f32.mrf.mxu1 }
 0x14a   : > { %890 = vst [vmem:[%s1704_s21 + $0x58] sm:$0xff] %v796_v50  ;;  %906 = vst [vmem:[%s1704_s21 + $0xd8] sm:$0xff] %v860_v51  ;;  %v1146_v54 = vadd.f32 %v1145_v52, %v1144_v48  ;;  %v1194_v55 = vadd.f32 %v1193_v53, %v1192_v49 }
 0x14b   : > { %v1147_v56 = vpop.f32.mrf.mxu0  ;;  %v1195_v57 = vpop.f32.mrf.mxu1 }
 0x14c   : > { %v801_v58 = vadd.f32 %v1146_v54, %v1700_v18  ;;  %v865_v59 = vadd.f32 %v1194_v55, %v1700_v18 }
 0x14d   : > { %v1148_v60 = vpop.f32.mrf.mxu0  ;;  %v1196_v61 = vpop.f32.mrf.mxu1 }
 0x14e   : > { %891 = vst [vmem:[%s1704_s21 + $0x60] sm:$0xff] %v801_v58  ;;  %907 = vst [vmem:[%s1704_s21 + $0xe0] sm:$0xff] %v865_v59  ;;  %v1149_v62 = vadd.f32 %v1148_v60, %v1147_v56  ;;  %v1197_v63 = vadd.f32 %v1196_v61, %v1195_v57 }
 0x14f   : > { %v1150_v0 = vpop.f32.mrf.mxu0  ;;  %v1198_v1 = vpop.f32.mrf.mxu1 }
 0x150   : > { %v804_v2 = vadd.f32 %v1149_v62, %v1700_v18  ;;  %v868_v3 = vadd.f32 %v1197_v63, %v1700_v18 }
 0x151   : > { %v1151_v4 = vpop.f32.mrf.mxu0  ;;  %v1199_v5 = vpop.f32.mrf.mxu1 }
 0x152   : > { %892 = vst [vmem:[%s1704_s21 + $0x68] sm:$0xff] %v804_v2  ;;  %908 = vst [vmem:[%s1704_s21 + $0xe8] sm:$0xff] %v868_v3  ;;  %v1152_v6 = vadd.f32 %v1151_v4, %v1150_v0  ;;  %v1200_v7 = vadd.f32 %v1199_v5, %v1198_v1 }
 0x153   : > { %v1153_v8 = vpop.f32.mrf.mxu0  ;;  %v1201_v9 = vpop.f32.mrf.mxu1 }
 0x154   : > { %v809_v10 = vadd.f32 %v1152_v6, %v1700_v18  ;;  %v873_v11 = vadd.f32 %v1200_v7, %v1700_v18 }
 0x155   : > { %v1154_v12 = vpop.f32.mrf.mxu0  ;;  %v1202_v13 = vpop.f32.mrf.mxu1 }
 0x156   : > { %893 = vst [vmem:[%s1704_s21 + $0x70] sm:$0xff] %v809_v10  ;;  %909 = vst [vmem:[%s1704_s21 + $0xf0] sm:$0xff] %v873_v11  ;;  %v1155_v14 = vadd.f32 %v1154_v12, %v1153_v8  ;;  %v1203_v15 = vadd.f32 %v1202_v13, %v1201_v9 }
 0x158   : > { %v812_v16 = vadd.f32 %v1155_v14, %v1700_v18  ;;  %v876_v17 = vadd.f32 %v1203_v15, %v1700_v18 }
 0x15a   : > { %894 = vst [vmem:[%s1704_s21 + $0x78] sm:$0xff] %v812_v16  ;;  %910 = vst [vmem:[%s1704_s21 + $0xf8] sm:$0xff] %v876_v17 }
 0x15b   : > { %1355 = shalt.err (!%p1352_p8)
}
 0x15c   : > { %s1356_s8 = scalar_lea.hbm %s1769_s29, 4096  ;;  %s1360_s11 = scalar_lea.hbm %s1826_s3, 8192 }
 0x15d   : > { %p1357_p11 = scmp.ne.s32.totalorder %s1769_s29, %s1356_s8  ;;  %p1361_p0 = scmp.lt.s32.totalorder %s1769_s29, %s1826_s3 }
 0x15e   : > { %p1362_p1 = scmp.lt.s32.totalorder %s1360_s11, %s1356_s8 }
 0x15f   : > { %p1358_p12 = pnand %p1357_p11, %p1483_p5 }
 0x160   : > { %p1363_p2 = por %p1362_p1, %p1361_p0 }
 0x161   : > { %p1359_p13 = pneg %p1358_p12 }
 0x163   : > { %p1364_p3 = pnand %p1363_p2, %p1359_p13 }
 0x165   : > { %1367 = shalt.err (!%p1364_p3)
}
 0x166   : > { %s1421_s21 = smov 128   ;;  %s1422_s23 = smov 256  }
 0x167   : > { %s1423_s27 = smov 8  }
 0x168   : > { %1220 = dma.vmem_to_hbm [thread:$0]  (%p1483_p5), %s1771_s26, 4096, %s1769_s29, %s912_s15, %s1421_s21, %s1422_s23, %s1423_s27  }
 0x169 PF: > { %s942_s28 = sand.u32 1, %s1398_s12   ;;  %p1223_p4 = pnand %p1033_p10, %p1494_p9 }
 0x16a   : > { %s943_s30 = scalar_lea.sflag [#allocation4], %s942_s28 }
 0x16b   : > { %p1224_p6 = pneg %p1223_p4 }
 0x16d   : > { %1393 = dma.done.wait (%p1224_p6), %s943_s30, 4096  }
 0x16e   : > { %1395 = vsyncadd (%p1224_p6), %s943_s30, 4294963200  ;;  %s16_s17 = sadd.s32 1, %s1418_s17   ;;  %s1829_s12 = smov %s1402_s13 }
 0x16f   : > { %p13_p7 = scmp.ge.s32.totalorder %s16_s17, 4   ;;  %s1830_s13 = smov %s1406_s14 }
 0x170   : > { %s1831_s14 = smov %s1492_s24  ;;  %s1832_s15 = smov %s1414_s16 }
 0x171   : > { %s1833_s16 = smov %s1835_s20  ;;  %15 = sbr.rel (!%p13_p7) target bundleno = 4 (0x4), region = 119 }
 0x176   :  { %948 = vsyncpa [#allocation4], 1 }
 0x177   :  { %950 = vsyncpa [#allocation4 + $0x1], 1 }

</bundles_post_ra>
